<compile_context>
chip_gen: v5e
topology: v5e:2x2
jax: 0.10.0
libtpu: 0.0.40
codegen_flags: <defaults>
</compile_context>

<pallas_src>
import numpy as np
import jax
import jax.numpy as jnp
from jax.experimental import pallas as pl
from jax.experimental.pallas import tpu as pltpu


# ----------------------------------------------------------------------------
# Trace-time (wrapper-side) parameter re-layout helpers — static-shape only.
# ----------------------------------------------------------------------------
def _make_banded_conv_weight(w, W):
    """w: (3, 3, Cin, Cout) HWIO -> (W*Cin, 3*W*Cout) f32 banded matrix.

    Column block dy holds the contribution of input row (i + dy - 1); inside a
    block, the W-direction taps and zero padding are encoded as a banded block
    structure, so a whole conv row becomes a single matmul.
    """
    _, _, cin, cout = w.shape
    P = np.zeros((3, W, W), np.float32)          # P[dx, jin, j] = [jin == j+dx-1]
    for dx in range(3):
        for j in range(W):
            jin = j + dx - 1
            if 0 <= jin < W:
                P[dx, jin, j] = 1.0
    P = jnp.asarray(P)
    blocks = [
        jnp.einsum('xij,xcd->icjd', P, w[dy]).reshape(W * cin, W * cout)
        for dy in range(3)
    ]
    return jnp.concatenate(blocks, axis=1)       # f32; cast once when slabbed


def _make_gap_fc1(fc1w, W, H, C):
    """Fuse GAP (mean over W positions AND the 1/H row-mean scale) into fc1.

    Returns (W*C, HID) f32: gfc1[j*C + c, h] = fc1w[c, h] / (W*H).
    """
    G = np.zeros((W * C, C), np.float32)
    for j in range(W):
        G[j * C:(j + 1) * C, :] = np.eye(C, dtype=np.float32)
    G /= float(W * H)
    return jnp.asarray(G) @ fc1w.astype(jnp.float32)


# ----------------------------------------------------------------------------
# Forward pass
# ----------------------------------------------------------------------------
def custom_resnet_forward(x_nchw, params):
    """x_nchw: (B, Cin, H, W) float32 (PyTorch layout). Returns (B, 1)."""
    (w1, b1, w2, b2, w3, b3, fc1w, fc1b, fc2w, fc2b) = params
    B, Cin, H, W = x_nchw.shape
    C = w1.shape[-1]
    HID = fc1w.shape[-1]
    BH = B * H
    WC = W * C
    assert W * Cin <= WC, "stem input width must fit the feature lane width"

    # Channels-last, lane-packed rows, zero-padded to WC lanes (lane-dense):
    # xp[b*H + i, j*Cin + ci] = x[b, ci, i, j].
    xp = jnp.transpose(x_nchw, (0, 2, 3, 1)).astype(jnp.float32).reshape(BH, W * Cin)
    xp = jnp.pad(xp, ((0, 0), (0, WC - W * Cin)))

    # --- bf16 weight slab: [wb1 | wb2 | wb3 | gap@fc1], 128-aligned columns ---
    wb1 = jnp.pad(_make_banded_conv_weight(w1, W), ((0, WC - W * Cin), (0, 0)))
    wb2 = _make_banded_conv_weight(w2, W)
    wb3 = _make_banded_conv_weight(w3, W)
    gfc1 = _make_gap_fc1(fc1w, W, H, C)
    wslab = jnp.concatenate([wb1, wb2, wb3, gfc1], axis=1).astype(jnp.bfloat16)

    # --- small f32 slab: biases, fc2 weights, pool indicators, edge masks ---
    FS = max(WC, HID, BH, 2)
    _POOL = 6          # rows [6, 6+B): 0/1 per-image row-indicator (sum over H)
    _MASK = 6 + B      # rows [6+B, 6+B+BH): col 0 = up edge mask, col 1 = down

    pm = np.zeros((B, BH), np.float32)
    for b in range(B):
        pm[b, b * H:(b + 1) * H] = 1.0                       # 1/H folded into gfc1
    ridx = np.arange(BH)
    mask_cols = np.stack([(ridx % H != 0).astype(np.float32),        # up-shift ok
                          (ridx % H != H - 1).astype(np.float32)],   # down-shift ok
                         axis=1)                                     # (BH, 2)

    def _pad_cols(a):
        a = jnp.asarray(a, jnp.float32).reshape(-1, a.shape[-1] if a.ndim > 1 else a.size)
        return jnp.pad(a, ((0, 0), (0, FS - a.shape[1])))

    fslab = jnp.concatenate([
        _pad_cols(jnp.tile(b1, (1, W))),          # row 0: conv1 bias per (j, c)
        _pad_cols(jnp.tile(b2, (1, W))),          # row 1
        _pad_cols(jnp.tile(b3, (1, W))),          # row 2
        _pad_cols(fc1b.reshape(1, HID)),          # row 3
        _pad_cols(fc2w.reshape(1, HID)),          # row 4
        _pad_cols(fc2b.reshape(1, 1)),            # row 5
        _pad_cols(pm),                            # rows 6 .. 6+B-1
        _pad_cols(mask_cols),                     # rows 6+B .. 6+B+BH-1
    ], axis=0)                                    # (6 + B + BH, FS)

    def kernel(xp_ref, wslab_ref, fslab_ref, out_ref):
        # (BH, 1) 0/1 edge masks: the rolls below wrap across image / batch
        # boundaries exactly where these masks zero the contribution, so the
        # conv's zero padding semantics are preserved.
        up_mask = fslab_ref[_MASK:_MASK + BH, 0:1]
        dn_mask = fslab_ref[_MASK:_MASK + BH, 1:2]

        def conv3x3(x_f32, col0, brow_row):
            # One lane-dense bf16 MXU matmul produces the three row-offset
            # partial sums side by side (BH, 3*WC); sublane rolls + edge masks
            # realign rows (replacing the old (BH,BH) f32 shift matmuls).
            wb = wslab_ref[:, col0:col0 + 3 * WC]
            z = jnp.dot(x_f32.astype(jnp.bfloat16), wb,
                        preferred_element_type=jnp.float32)
            z_up = pltpu.roll(z[:, :WC], shift=1, axis=0) * up_mask        # z[r-1]
            z_dn = pltpu.roll(z[:, 2 * WC:], shift=BH - 1, axis=0) * dn_mask  # z[r+1]
            brow = fslab_ref[brow_row:brow_row + 1, 0:WC]
            return z_up + z[:, WC:2 * WC] + z_dn + brow

        # ---- cnn: stem conv + ReLU ----
        feat = jnp.maximum(conv3x3(xp_ref[...], 0, 0), 0.0)        # (BH, WC)

        # ---- cnn: basic residual block ----
        g = jnp.maximum(conv3x3(feat, 3 * WC, 1), 0.0)
        feat = jnp.maximum(feat + conv3x3(g, 6 * WC, 2), 0.0)

        # ---- cnn tail + mlp head ----
        # Global average pool: per-image row sum via a tiny 0/1 matmul; the
        # 1/(H*W) mean and the W-position grouping are fused into gfc1, and the
        # dead relu(pooled) is dropped (pooled >= 0 since feat >= 0).
        poolm = fslab_ref[_POOL:_POOL + B, 0:BH].astype(jnp.bfloat16)      # (B, BH)
        rowsum = jnp.dot(poolm, feat.astype(jnp.bfloat16),
                         preferred_element_type=jnp.float32)               # (B, WC)
        gfc1_w = wslab_ref[:, 9 * WC:9 * WC + HID]                         # (WC, HID)
        z1 = jnp.dot(rowsum.astype(jnp.bfloat16), gfc1_w,
                     preferred_element_type=jnp.float32)
        z1 = jnp.maximum(z1 + fslab_ref[3:4, 0:HID], 0.0)                  # (B, HID)
        # fc2 (N=1) as VPU multiply + lane reduction — no MXU round trip.
        z2 = jnp.sum(z1 * fslab_ref[4:5, 0:HID], axis=1, keepdims=True)
        z2 = z2 + fslab_ref[5:6, 0:1]
        out_ref[...] = jax.nn.sigmoid(z2)
        # TODO(synk): for large B, switch to a "parallel" batch grid axis
        # (second TensorCore on v7x) and a lane-dense padded output slab.

    vmem = pl.BlockSpec(memory_space=pltpu.MemorySpace.VMEM)
    return pl.pallas_call(
        kernel,
        out_shape=jax.ShapeDtypeStruct((B, 1), jnp.float32),
        in_specs=[vmem, vmem, vmem],
        out_specs=vmem,
    )(xp, wslab, fslab)


def init_params(key, cin=4, c=8, hidden=256):
    ks = jax.random.split(key, 10)
    w1 = jax.random.normal(ks[0], (3, 3, cin, c), jnp.float32) * 0.1
    b1 = jax.random.normal(ks[1], (1, c), jnp.float32) * 0.1
    w2 = jax.random.normal(ks[2], (3, 3, c, c), jnp.float32) * 0.1
    b2 = jax.random.normal(ks[3], (1, c), jnp.float32) * 0.1
    w3 = jax.random.normal(ks[4], (3, 3, c, c), jnp.float32) * 0.1
    b3 = jax.random.normal(ks[5], (1, c), jnp.float32) * 0.1
    fc1w = jax.random.normal(ks[6], (c, hidden), jnp.float32) * 0.1
    fc1b = jax.random.normal(ks[7], (1, hidden), jnp.float32) * 0.1
    fc2w = jax.random.normal(ks[8], (hidden, 1), jnp.float32) * 0.1
    fc2b = jax.random.normal(ks[9], (1, 1), jnp.float32) * 0.1
    return (w1, b1, w2, b2, w3, b3, fc1w, fc1b, fc2w, fc2b)


if __name__ == "__main__":
    key = jax.random.PRNGKey(0)
    k_x, k_p = jax.random.split(key)

    # Small shapes consistent with the module: batch=2, channels=4, spatial=16.
    x = jax.random.normal(k_x, (2, 4, 16, 16), jnp.float32)
    params = init_params(k_p, cin=4, c=8, hidden=256)

    out = custom_resnet_forward(x, params)
    out = jax.block_until_ready(out)
    assert out.shape == (2, 1), out.shape
    assert bool(jnp.all((out >= 0.0) & (out <= 1.0)))
    print("KERNEL_OK")
</pallas_src>

<mosaic_0001>
module attributes {stable_mosaic.version = 11 : i64} {
  func.func @kernel(%arg0: memref<32x128xf32, #tpu.memory_space<vmem>>, %arg1: memref<128x1408xbf16, #tpu.memory_space<vmem>>, %arg2: memref<40x256xf32, #tpu.memory_space<vmem>>, %arg3: memref<2x1xf32, #tpu.memory_space<vmem>>) attributes {dimension_semantics = [], scalar_prefetch = 0 : i64, scratch_operands = 0 : i64, tpu.core_type = #tpu.core_type<tc>} {
    %c8 = arith.constant 8 : index
    %c0 = arith.constant 0 : index
    %0 = vector.load %arg2[%c8, %c0] : memref<40x256xf32, #tpu.memory_space<vmem>>, vector<32x1xf32>
    %c8_0 = arith.constant 8 : index
    %c1 = arith.constant 1 : index
    %1 = vector.load %arg2[%c8_0, %c1] : memref<40x256xf32, #tpu.memory_space<vmem>>, vector<32x1xf32>
    %c0_1 = arith.constant 0 : index
    %c0_2 = arith.constant 0 : index
    %2 = vector.load %arg0[%c0_1, %c0_2] : memref<32x128xf32, #tpu.memory_space<vmem>>, vector<32x128xf32>
    %c0_3 = arith.constant 0 : index
    %c0_4 = arith.constant 0 : index
    %3 = vector.load %arg1[%c0_3, %c0_4] : memref<128x1408xbf16, #tpu.memory_space<vmem>>, vector<128x384xbf16>
    %4 = arith.truncf %2 : vector<32x128xf32> to vector<32x128xbf16>
    %cst = arith.constant dense<0.000000e+00> : vector<32x384xf32>
    %5 = tpu.matmul %4, %3, %cst {dimension_numbers = #tpu.dot_dimension_numbers<[1], [0], [0], [1], [0, 0, 1, 1], [], []>} : vector<32x128xbf16>, vector<128x384xbf16>, vector<32x384xf32> -> vector<32x384xf32>
    %6 = vector.extract_strided_slice %5 {offsets = [0, 0], sizes = [32, 128], strides = [1, 1]} : vector<32x384xf32> to vector<32x128xf32>
    %c1_i32 = arith.constant 1 : i32
    %7 = tpu.dynamic_rotate %6 by %c1_i32 dim 0 : vector<32x128xf32>, i32 -> vector<32x128xf32>
    %8 = vector.broadcast %0 : vector<32x1xf32> to vector<32x128xf32>
    %9 = arith.mulf %7, %8 : vector<32x128xf32>
    %10 = vector.extract_strided_slice %5 {offsets = [0, 256], sizes = [32, 128], strides = [1, 1]} : vector<32x384xf32> to vector<32x128xf32>
    %c31_i32 = arith.constant 31 : i32
    %11 = tpu.dynamic_rotate %10 by %c31_i32 dim 0 : vector<32x128xf32>, i32 -> vector<32x128xf32>
    %12 = vector.broadcast %1 : vector<32x1xf32> to vector<32x128xf32>
    %13 = arith.mulf %11, %12 : vector<32x128xf32>
    %c0_5 = arith.constant 0 : index
    %c0_6 = arith.constant 0 : index
    %14 = vector.load %arg2[%c0_5, %c0_6] : memref<40x256xf32, #tpu.memory_space<vmem>>, vector<1x128xf32>
    %15 = vector.extract_strided_slice %5 {offsets = [0, 128], sizes = [32, 128], strides = [1, 1]} : vector<32x384xf32> to vector<32x128xf32>
    %16 = arith.addf %9, %15 : vector<32x128xf32>
    %17 = arith.addf %16, %13 : vector<32x128xf32>
    %18 = vector.broadcast %14 : vector<1x128xf32> to vector<32x128xf32>
    %19 = arith.addf %17, %18 : vector<32x128xf32>
    %cst_7 = arith.constant 0.000000e+00 : f32
    %20 = vector.broadcast %cst_7 : f32 to vector<32x128xf32>
    %21 = arith.maximumf %19, %20 : vector<32x128xf32>
    %c0_8 = arith.constant 0 : index
    %c384 = arith.constant 384 : index
    %22 = vector.load %arg1[%c0_8, %c384] : memref<128x1408xbf16, #tpu.memory_space<vmem>>, vector<128x384xbf16>
    %23 = arith.truncf %21 : vector<32x128xf32> to vector<32x128xbf16>
    %cst_9 = arith.constant dense<0.000000e+00> : vector<32x384xf32>
    %24 = tpu.matmul %23, %22, %cst_9 {dimension_numbers = #tpu.dot_dimension_numbers<[1], [0], [0], [1], [0, 0, 1, 1], [], []>} : vector<32x128xbf16>, vector<128x384xbf16>, vector<32x384xf32> -> vector<32x384xf32>
    %25 = vector.extract_strided_slice %24 {offsets = [0, 0], sizes = [32, 128], strides = [1, 1]} : vector<32x384xf32> to vector<32x128xf32>
    %c1_i32_10 = arith.constant 1 : i32
    %26 = tpu.dynamic_rotate %25 by %c1_i32_10 dim 0 : vector<32x128xf32>, i32 -> vector<32x128xf32>
    %27 = vector.broadcast %0 : vector<32x1xf32> to vector<32x128xf32>
    %28 = arith.mulf %26, %27 : vector<32x128xf32>
    %29 = vector.extract_strided_slice %24 {offsets = [0, 256], sizes = [32, 128], strides = [1, 1]} : vector<32x384xf32> to vector<32x128xf32>
    %c31_i32_11 = arith.constant 31 : i32
    %30 = tpu.dynamic_rotate %29 by %c31_i32_11 dim 0 : vector<32x128xf32>, i32 -> vector<32x128xf32>
    %31 = vector.broadcast %1 : vector<32x1xf32> to vector<32x128xf32>
    %32 = arith.mulf %30, %31 : vector<32x128xf32>
    %c1_12 = arith.constant 1 : index
    %c0_13 = arith.constant 0 : index
    %33 = vector.load %arg2[%c1_12, %c0_13] : memref<40x256xf32, #tpu.memory_space<vmem>>, vector<1x128xf32>
    %34 = vector.extract_strided_slice %24 {offsets = [0, 128], sizes = [32, 128], strides = [1, 1]} : vector<32x384xf32> to vector<32x128xf32>
    %35 = arith.addf %28, %34 : vector<32x128xf32>
    %36 = arith.addf %35, %32 : vector<32x128xf32>
    %37 = vector.broadcast %33 : vector<1x128xf32> to vector<32x128xf32>
    %38 = arith.addf %36, %37 : vector<32x128xf32>
    %cst_14 = arith.constant 0.000000e+00 : f32
    %39 = vector.broadcast %cst_14 : f32 to vector<32x128xf32>
    %40 = arith.maximumf %38, %39 : vector<32x128xf32>
    %c0_15 = arith.constant 0 : index
    %c768 = arith.constant 768 : index
    %41 = vector.load %arg1[%c0_15, %c768] : memref<128x1408xbf16, #tpu.memory_space<vmem>>, vector<128x384xbf16>
    %42 = arith.truncf %40 : vector<32x128xf32> to vector<32x128xbf16>
    %cst_16 = arith.constant dense<0.000000e+00> : vector<32x384xf32>
    %43 = tpu.matmul %42, %41, %cst_16 {dimension_numbers = #tpu.dot_dimension_numbers<[1], [0], [0], [1], [0, 0, 1, 1], [], []>} : vector<32x128xbf16>, vector<128x384xbf16>, vector<32x384xf32> -> vector<32x384xf32>
    %44 = vector.extract_strided_slice %43 {offsets = [0, 0], sizes = [32, 128], strides = [1, 1]} : vector<32x384xf32> to vector<32x128xf32>
    %c1_i32_17 = arith.constant 1 : i32
    %45 = tpu.dynamic_rotate %44 by %c1_i32_17 dim 0 : vector<32x128xf32>, i32 -> vector<32x128xf32>
    %46 = vector.broadcast %0 : vector<32x1xf32> to vector<32x128xf32>
    %47 = arith.mulf %45, %46 : vector<32x128xf32>
    %48 = vector.extract_strided_slice %43 {offsets = [0, 256], sizes = [32, 128], strides = [1, 1]} : vector<32x384xf32> to vector<32x128xf32>
    %c31_i32_18 = arith.constant 31 : i32
    %49 = tpu.dynamic_rotate %48 by %c31_i32_18 dim 0 : vector<32x128xf32>, i32 -> vector<32x128xf32>
    %50 = vector.broadcast %1 : vector<32x1xf32> to vector<32x128xf32>
    %51 = arith.mulf %49, %50 : vector<32x128xf32>
    %c2 = arith.constant 2 : index
    %c0_19 = arith.constant 0 : index
    %52 = vector.load %arg2[%c2, %c0_19] : memref<40x256xf32, #tpu.memory_space<vmem>>, vector<1x128xf32>
    %53 = vector.extract_strided_slice %43 {offsets = [0, 128], sizes = [32, 128], strides = [1, 1]} : vector<32x384xf32> to vector<32x128xf32>
    %54 = arith.addf %47, %53 : vector<32x128xf32>
    %55 = arith.addf %54, %51 : vector<32x128xf32>
    %56 = vector.broadcast %52 : vector<1x128xf32> to vector<32x128xf32>
    %57 = arith.addf %55, %56 : vector<32x128xf32>
    %58 = arith.addf %21, %57 : vector<32x128xf32>
    %cst_20 = arith.constant 0.000000e+00 : f32
    %59 = vector.broadcast %cst_20 : f32 to vector<32x128xf32>
    %60 = arith.maximumf %58, %59 : vector<32x128xf32>
    %c6 = arith.constant 6 : index
    %c0_21 = arith.constant 0 : index
    %61 = vector.load %arg2[%c6, %c0_21] : memref<40x256xf32, #tpu.memory_space<vmem>>, vector<2x32xf32>
    %62 = arith.truncf %61 : vector<2x32xf32> to vector<2x32xbf16>
    %63 = arith.truncf %60 : vector<32x128xf32> to vector<32x128xbf16>
    %cst_22 = arith.constant dense<0.000000e+00> : vector<2x128xf32>
    %64 = tpu.matmul %62, %63, %cst_22 {dimension_numbers = #tpu.dot_dimension_numbers<[1], [0], [0], [1], [0, 0, 1, 1], [], []>} : vector<2x32xbf16>, vector<32x128xbf16>, vector<2x128xf32> -> vector<2x128xf32>
    %c0_23 = arith.constant 0 : index
    %c1152 = arith.constant 1152 : index
    %65 = vector.load %arg1[%c0_23, %c1152] : memref<128x1408xbf16, #tpu.memory_space<vmem>>, vector<128x256xbf16>
    %66 = arith.truncf %64 : vector<2x128xf32> to vector<2x128xbf16>
    %cst_24 = arith.constant dense<0.000000e+00> : vector<2x256xf32>
    %67 = tpu.matmul %66, %65, %cst_24 {dimension_numbers = #tpu.dot_dimension_numbers<[1], [0], [0], [1], [0, 0, 1, 1], [], []>} : vector<2x128xbf16>, vector<128x256xbf16>, vector<2x256xf32> -> vector<2x256xf32>
    %c3 = arith.constant 3 : index
    %c0_25 = arith.constant 0 : index
    %68 = vector.load %arg2[%c3, %c0_25] : memref<40x256xf32, #tpu.memory_space<vmem>>, vector<1x256xf32>
    %69 = vector.broadcast %68 : vector<1x256xf32> to vector<2x256xf32>
    %70 = arith.addf %67, %69 : vector<2x256xf32>
    %cst_26 = arith.constant 0.000000e+00 : f32
    %71 = vector.broadcast %cst_26 : f32 to vector<2x256xf32>
    %72 = arith.maximumf %70, %71 : vector<2x256xf32>
    %c4 = arith.constant 4 : index
    %c0_27 = arith.constant 0 : index
    %73 = vector.load %arg2[%c4, %c0_27] : memref<40x256xf32, #tpu.memory_space<vmem>>, vector<1x256xf32>
    %74 = vector.broadcast %73 : vector<1x256xf32> to vector<2x256xf32>
    %75 = arith.mulf %72, %74 : vector<2x256xf32>
    %cst_28 = arith.constant dense<0.000000e+00> : vector<2xf32>
    %76 = vector.multi_reduction <add>, %75, %cst_28 [1] : vector<2x256xf32> to vector<2xf32>
    %77 = vector.shape_cast %76 : vector<2xf32> to vector<2x1xf32>
    %c5 = arith.constant 5 : index
    %c0_29 = arith.constant 0 : index
    %78 = vector.load %arg2[%c5, %c0_29] : memref<40x256xf32, #tpu.memory_space<vmem>>, vector<1x1xf32>
    %79 = vector.broadcast %78 : vector<1x1xf32> to vector<2x1xf32>
    %80 = arith.addf %77, %79 : vector<2x1xf32>
    %81 = arith.negf %80 : vector<2x1xf32>
    %82 = math.exp %81 : vector<2x1xf32>
    %cst_30 = arith.constant 1.000000e+00 : f32
    %83 = vector.broadcast %cst_30 : f32 to vector<2x1xf32>
    %84 = arith.addf %83, %82 : vector<2x1xf32>
    %85 = arith.divf %83, %84 : vector<2x1xf32>
    %c0_31 = arith.constant 0 : index
    %c0_32 = arith.constant 0 : index
    %86 = vector.load %arg3[%c0_31, %c0_32] : memref<2x1xf32, #tpu.memory_space<vmem>>, vector<2x1xf32>
    tpu.vector_store %arg3[%c0_31, %c0_32], %85 {strides = array<i32>} : memref<2x1xf32, #tpu.memory_space<vmem>>, vector<2x1xf32>,
    return
  }
}

</mosaic_0001>

<bundles_post_ra>
// kernel: tpu_custom_call.1
= control target key start
LH: loop header
LB: loop body
LE: loop exit
PB: predicated region body
PF: predicated region fallthrough
CT: control target
= control target key end

     0   :  { %8 = vsyncpa [#allocation3], 0  ;;  %s1799_s0 = inlined_call_operand.hbm [shape: f32[32,128], index: 0, kind: input, shape index: {}]   ;;  %s1800_s1 = inlined_call_operand.hbm [shape: bf16[128,1408], index: 1, kind: input, shape index: {}]   ;;  %s1801_s2 = inlined_call_operand.hbm [shape: f32[40,256], index: 2, kind: input, shape index: {}]   ;;  %s1802_s3 = inlined_call_operand.vmem [shape: f32[2,1], index: 3, kind: output, shape index: {}]  }
   0x1   :  { %9 = vsyncpa [#allocation5], 0  ;;  %s27_s14 = sshll.u32 %s1800_s1, 4  ;;  %s1630_s15 = smov [#allocation4]   ;;  %s28_s14 = int_to_ptr.hbm [resolvable:$true] %s27_s14 }
   0x2   :  { %s29_s16 = sshll.u32 %s1630_s15, 4  ;;  %s14_s19 = sshll.u32 %s1799_s0, 4  ;;  %s30_s16 = int_to_ptr.vmem [resolvable:$true] %s29_s16  ;;  %s15_s19 = int_to_ptr.hbm [resolvable:$true] %s14_s19 }
   0x3   :  { %s1631_s20 = smov 704   ;;  %s1632_s21 = smov 44  }
   0x4   :  { %35 = dma.hbm_to_vmem [thread:$0]  %s28_s14, 11264, %s30_s16, [#allocation5], %s1631_s20, %s1631_s20, %s1632_s21  }
   0x5   :  { %s1633_s22 = smov [#allocation2]   ;;  %s1634_s24 = smov 128  }
   0x6   :  { %s16_s23 = sshll.u32 %s1633_s22, 4  ;;  %s1635_s25 = smov 8   ;;  %s17_s23 = int_to_ptr.vmem [resolvable:$true] %s16_s23 }
   0x7   :  { %22 = dma.hbm_to_vmem [thread:$0]  %s15_s19, 512, %s17_s23, [#allocation3], %s1634_s24, %s1634_s24, %s1635_s25  }
   0x8   :  { %s40_s27 = sshll.u32 %s1801_s2, 4  ;;  %s1636_s28 = smov [#allocation6]   ;;  %s41_s27 = int_to_ptr.hbm [resolvable:$true] %s40_s27 }
   0x9   :  { %s42_s29 = sshll.u32 %s1636_s28, 4  ;;  %s1637_s30 = smov 256   ;;  %s43_s29 = int_to_ptr.vmem [resolvable:$true] %s42_s29 }
   0xa   :  { %s1638_s0 = smov 16  }
   0xb   :  { %48 = dma.hbm_to_vmem [thread:$0]  %s41_s27, 1280, %s43_s29, [#allocation5], %s1637_s30, %s1637_s30, %s1638_s0  }
   0xc   :  { %1626 = dma.done.wait [#allocation3], 512  }
   0xd   :  { %1627 = vsyncadd [#allocation3], 4294966784 }
   0xe   :  { %1628 = dma.done.wait [#allocation5], 12544  }
   0xf   :  { %1629 = vsyncadd [#allocation5], 4294954752  ;;  %v1179_v0 = vld [vmem:[#allocation4 + $0x268] sm:$0xf]  ;;  %v1469_v1 = vld [vmem:[#allocation4 + $0x290] sm:$0xf0] }
  0x10   :  { %v1187_v2 = vld [vmem:[#allocation4 + $0x270] sm:$0xf]  ;;  %v1180_v3 = vor.u32 %v1469_v1, %v1179_v0  ;;  %v1470_v4 = vld [vmem:[#allocation4 + $0x298] sm:$0xf0]  ;;  %v1175_v8 = vld [vmem:[#allocation4 + $0x218] sm:$0xf] }
  0x11   :  { %v1167_v5 = vld [vmem:[#allocation4 + $0x210] sm:$0xf]  ;;  %v1466_v6 = vld [vmem:[#allocation4 + $0x238] sm:$0xf0]  ;;  %v1188_v7 = vor.u32 %v1470_v4, %v1187_v2  ;;  %v1467_v9 = vld [vmem:[#allocation4 + $0x240] sm:$0xf0] }
  0x12   :  { %v1468_v10 = vld [vmem:[#allocation4 + $0x26c] sm:$0xf]  ;;  %232 = vmatpush.bf16.msra.mxu0 %v1180_v3  ;;  %v1168_v11 = vor.u32 %v1466_v6, %v1167_v5  ;;  %v1181_v12 = vld [vmem:[#allocation4 + $0x294] sm:$0xf0]  ;;  %v1176_v13 = vor.u32 %v1467_v9, %v1175_v8  ;;  %v1463_v16 = vld [vmem:[#allocation4 + $0x1e0] sm:$0xf0] }
  0x13   :  { %270 = vmatpush.bf16.msra.mxu2 %v1188_v7  ;;  %v1184_v14 = vor.u32 %v1468_v10, %v1181_v12  ;;  %v1155_v15 = vld [vmem:[#allocation4 + $0x1b8] sm:$0xf]  ;;  %v1465_v17 = vld [vmem:[#allocation4 + $0x214] sm:$0xf]  ;;  %v1163_v18 = vld [vmem:[#allocation4 + $0x1c0] sm:$0xf] }
  0x14   :  { %v1464_v19 = vld [vmem:[#allocation4 + $0x1e8] sm:$0xf0]  ;;  %v1169_v20 = vld [vmem:[#allocation4 + $0x23c] sm:$0xf0]  ;;  %v1156_v22 = vor.u32 %v1463_v16, %v1155_v15  ;;  %v1462_v23 = vld [vmem:[#allocation4 + $0x1bc] sm:$0xf] }
  0x15   :  { %251 = vmatpush.bf16.msra.mxu1 %v1184_v14  ;;  %v1172_v21 = vor.u32 %v1465_v17, %v1169_v20  ;;  %v1157_v24 = vld [vmem:[#allocation4 + $0x1e4] sm:$0xf0]  ;;  %v1164_v25 = vor.u32 %v1464_v19, %v1163_v18  ;;  %v1143_v26 = vld [vmem:[#allocation4 + $0x160] sm:$0xf]  ;;  %v1460_v27 = vld [vmem:[#allocation4 + $0x188] sm:$0xf0] }
  0x16   :  { %233 = vmatpush.bf16.msra.mxu0 %v1168_v11  ;;  %v1151_v28 = vld [vmem:[#allocation4 + $0x168] sm:$0xf]  ;;  %v1461_v29 = vld [vmem:[#allocation4 + $0x190] sm:$0xf0]  ;;  %v1160_v30 = vor.u32 %v1462_v23, %v1157_v24  ;;  %v1144_v31 = vor.u32 %v1460_v27, %v1143_v26  ;;  %v1459_v32 = vld [vmem:[#allocation4 + $0x164] sm:$0xf] }
  0x17   :  { %271 = vmatpush.bf16.msra.mxu2 %v1176_v13  ;;  %v1145_v33 = vld [vmem:[#allocation4 + $0x18c] sm:$0xf0]  ;;  %v1152_v34 = vor.u32 %v1461_v29, %v1151_v28  ;;  %v1131_v35 = vld [vmem:[#allocation4 + $0x108] sm:$0xf]  ;;  %v1457_v36 = vld [vmem:[#allocation4 + $0x130] sm:$0xf0] }
  0x18   :  { %v1139_v37 = vld [vmem:[#allocation4 + $0x110] sm:$0xf]  ;;  %v1458_v38 = vld [vmem:[#allocation4 + $0x138] sm:$0xf0]  ;;  %v1148_v39 = vor.u32 %v1459_v32, %v1145_v33  ;;  %v1132_v40 = vor.u32 %v1457_v36, %v1131_v35  ;;  %v1456_v41 = vld [vmem:[#allocation4 + $0x10c] sm:$0xf] }
  0x19   :  { %252 = vmatpush.bf16.msra.mxu1 %v1172_v21  ;;  %v1133_v42 = vld [vmem:[#allocation4 + $0x134] sm:$0xf0]  ;;  %v1140_v43 = vor.u32 %v1458_v38, %v1139_v37  ;;  %v1119_v44 = vld [vmem:[#allocation4 + $0xb0] sm:$0xf]  ;;  %v1454_v45 = vld [vmem:[#allocation4 + $0xd8] sm:$0xf0] }
  0x1a   :  { %234 = vmatpush.bf16.msra.mxu0 %v1156_v22  ;;  %v1639_v46 = vmov 0   ;;  %v62_v47 = vld [vmem:[#allocation6 + $0x10] sm:$0xff]  ;;  %v1127_v48 = vld [vmem:[#allocation4 + $0xb8] sm:$0xf]  ;;  %v1455_v49 = vld [vmem:[#allocation4 + $0xe0] sm:$0xf0]  ;;  %v1136_v51 = vor.u32 %v1456_v41, %v1133_v42  ;;  %v1120_v52 = vor.u32 %v1454_v45, %v1119_v44 }
  0x1b   :  { %272 = vmatpush.bf16.msra.mxu2 %v1164_v25  ;;  %1546 = vset.pattern.permute.xlu0 %v1639_v46  ;;  %v1640_v50 = vmov 1   ;;  %v1453_v53 = vld [vmem:[#allocation4 + $0xb4] sm:$0xf]  ;;  %v1121_v54 = vld [vmem:[#allocation4 + $0xdc] sm:$0xf0]  ;;  %v1128_v55 = vor.u32 %v1455_v49, %v1127_v48  ;;  %v67_v10 = vld [vmem:[#allocation2 + $0x8] sm:$0xff] }
  0x1c   :  { %302 = vperm.xlu0 %1546, %v62_v47   ;;  %1547 = vset.pattern.permute.xlu1 %v1640_v50  ;;  %v1107_v56 = vld [vmem:[#allocation4 + $0x58] sm:$0xf]  ;;  %v1451_v57 = vld [vmem:[#allocation4 + $0x80] sm:$0xf0]  ;;  %v1115_v58 = vld [vmem:[#allocation4 + $0x60] sm:$0xf]  ;;  %v1124_v61 = vor.u32 %v1453_v53, %v1121_v54 }
  0x1d   :  { %253 = vmatpush.bf16.msra.mxu1 %v1160_v30  ;;  %334 = vperm.xlu1 %1547, %v62_v47   ;;  %v1452_v59 = vld [vmem:[#allocation4 + $0x88] sm:$0xf0]  ;;  %v64_v60 = vld [vmem:[#allocation6 + $0x30] sm:$0xff]  ;;  %v63_v62 = vld [vmem:[#allocation6 + $0x20] sm:$0xff]  ;;  %v1108_v63 = vor.u32 %v1451_v57, %v1107_v56  ;;  %vm900_vm2 = vcmask 261120   ;;  %vm1058_vm3 = vcmask 1041408  }
  0x1e   :  { %235 = vmatpush.bf16.msra.mxu0 %v1144_v31  ;;  %1548 = vset.pattern.permute.xlu2 %v1639_v46  ;;  %v1450_v0 = vld [vmem:[#allocation4 + $0x5c] sm:$0xf]  ;;  %v1109_v1 = vld [vmem:[#allocation4 + $0x84] sm:$0xf0]  ;;  %v1116_v2 = vor.u32 %v1452_v59, %v1115_v58  ;;  %v1095_v3 = vld [vmem:[#allocation4] sm:$0xf] }
  0x1f   :  { %273 = vmatpush.bf16.msra.mxu2 %v1152_v34  ;;  %312 = vperm.xlu2 %1548, %v64_v60   ;;  %v1448_v4 = vld [vmem:[#allocation4 + $0x28] sm:$0xf0]  ;;  %v1103_v5 = vld [vmem:[#allocation4 + $0x8] sm:$0xf]  ;;  %v1449_v6 = vld [vmem:[#allocation4 + $0x30] sm:$0xf0]  ;;  %v1112_v7 = vor.u32 %v1450_v0, %v1109_v1 }
  0x20   :  { %v66_v8 = vld [vmem:[#allocation2] sm:$0xff]  ;;  %v1096_v9 = vor.u32 %v1448_v4, %v1095_v3  ;;  %v1097_v12 = vld [vmem:[#allocation4 + $0x2c] sm:$0xf0]  ;;  %v1104_v13 = vor.u32 %v1449_v6, %v1103_v5  ;;  %v69_v18 = vld [vmem:[#allocation2 + $0x18] sm:$0xff]  ;;  %vm1085_vm6 = vcmask 1024  }
  0x21   :  { %254 = vmatpush.bf16.msra.mxu1 %v1148_v39  ;;  %v1447_v11 = vld [vmem:[#allocation4 + $0x4] sm:$0xf]  ;;  %v102_v15 = vpack.c.bf16 %v67_v10, %v66_v8  ;;  %v68_v17 = vld [vmem:[#allocation2 + $0x10] sm:$0xff]  ;;  %v1493_v21 = vld [vmem:[#allocation4 + $0x29c] sm:$0xf0] }
  0x22   :  { %236 = vmatpush.bf16.msra.mxu0 %v1132_v40  ;;  %v65_v14 = vld [vmem:[#allocation6 + $0x40] sm:$0xff]  ;;  %v1100_v16 = vor.u32 %v1447_v11, %v1097_v12  ;;  %v103_v19 = vpack.c.bf16 %v69_v18, %v68_v17  ;;  %v1275_v20 = vld [vmem:[#allocation4 + $0x274] sm:$0xf]  ;;  %v1492_v22 = vld [vmem:[#allocation4 + $0x278] sm:$0xf] }
  0x23   :  { %274 = vmatpush.bf16.msra.mxu2 %v1140_v43  ;;  %v1276_v23 = vor.u32 %v1493_v21, %v1275_v20  ;;  %v1277_v24 = vld [vmem:[#allocation4 + $0x2a0] sm:$0xf0]  ;;  %v1283_v25 = vld [vmem:[#allocation4 + $0x27c] sm:$0xf]  ;;  %v1494_v26 = vld [vmem:[#allocation4 + $0x2a4] sm:$0xf0] }
  0x24   :  { %307 = vperm.xlu0 %1546, %v63_v62   ;;  %v1280_v27 = vor.u32 %v1492_v22, %v1277_v24  ;;  %v1284_v28 = vor.u32 %v1494_v26, %v1283_v25  ;;  %v1263_v29 = vld [vmem:[#allocation4 + $0x21c] sm:$0xf]  ;;  %v1490_v30 = vld [vmem:[#allocation4 + $0x244] sm:$0xf0]  ;;  %v1489_v32 = vld [vmem:[#allocation4 + $0x220] sm:$0xf] }
  0x25   :  { %255 = vmatpush.bf16.msra.mxu1 %v1136_v51  ;;  %338 = vperm.xlu1 %1547, %v63_v62   ;;  %v1264_v31 = vor.u32 %v1490_v30, %v1263_v29  ;;  %v1265_v33 = vld [vmem:[#allocation4 + $0x248] sm:$0xf0]  ;;  %v1271_v34 = vld [vmem:[#allocation4 + $0x224] sm:$0xf]  ;;  %v1491_v36 = vld [vmem:[#allocation4 + $0x24c] sm:$0xf0] }
  0x26   :  { %237 = vmatpush.bf16.msra.mxu0 %v1120_v52  ;;  %532 = vmatpush.bf16.msra.mxu3 %v1276_v23  ;;  %v1268_v35 = vor.u32 %v1489_v32, %v1265_v33  ;;  %v1272_v37 = vor.u32 %v1491_v36, %v1271_v34  ;;  %v1251_v38 = vld [vmem:[#allocation4 + $0x1c4] sm:$0xf]  ;;  %v1487_v39 = vld [vmem:[#allocation4 + $0x1ec] sm:$0xf0]  ;;  %v1486_v40 = vld [vmem:[#allocation4 + $0x1c8] sm:$0xf]  ;;  %v293_v32 = vlaneseq }
  0x27   :  { %275 = vmatpush.bf16.msra.mxu2 %v1128_v55  ;;  %317 = vperm.xlu2 %1548, %v65_v14   ;;  %v1252_v41 = vor.u32 %v1487_v39, %v1251_v38  ;;  %v1253_v42 = vld [vmem:[#allocation4 + $0x1f0] sm:$0xf0]  ;;  %v1259_v43 = vld [vmem:[#allocation4 + $0x1cc] sm:$0xf]  ;;  %v1488_v45 = vld [vmem:[#allocation4 + $0x1f4] sm:$0xf0] }
  0x28   :  { %v1256_v44 = vor.u32 %v1486_v40, %v1253_v42  ;;  %v1260_v46 = vor.u32 %v1488_v45, %v1259_v43  ;;  %v1239_v47 = vld [vmem:[#allocation4 + $0x16c] sm:$0xf]  ;;  %v1484_v48 = vld [vmem:[#allocation4 + $0x194] sm:$0xf0]  ;;  %v1483_v49 = vld [vmem:[#allocation4 + $0x170] sm:$0xf] }
  0x29   :  { %256 = vmatpush.bf16.msra.mxu1 %v1124_v61  ;;  %v1241_v51 = vld [vmem:[#allocation4 + $0x198] sm:$0xf0]  ;;  %v1247_v52 = vld [vmem:[#allocation4 + $0x174] sm:$0xf]  ;;  %v1485_v53 = vld [vmem:[#allocation4 + $0x19c] sm:$0xf0] }
  0x2a   :  { %238 = vmatpush.bf16.msra.mxu0 %v1108_v63  ;;  %533 = vmatpush.bf16.msra.mxu3 %v1264_v31  ;;  %v1244_v54 = vor.u32 %v1483_v49, %v1241_v51  ;;  %v1248_v55 = vor.u32 %v1485_v53, %v1247_v52  ;;  %v1227_v56 = vld [vmem:[#allocation4 + $0x114] sm:$0xf]  ;;  %v1481_v57 = vld [vmem:[#allocation4 + $0x13c] sm:$0xf0]  ;;  %v1480_v58 = vld [vmem:[#allocation4 + $0x118] sm:$0xf] }
  0x2b   :  { %276 = vmatpush.bf16.msra.mxu2 %v1116_v2  ;;  %v1228_v59 = vor.u32 %v1481_v57, %v1227_v56  ;;  %v1235_v61 = vld [vmem:[#allocation4 + $0x11c] sm:$0xf]  ;;  %v1482_v62 = vld [vmem:[#allocation4 + $0x144] sm:$0xf0]  ;;  %v1477_v3 = vld [vmem:[#allocation4 + $0xc0] sm:$0xf] }
  0x2c   :  { %1549 = vset.pattern.permute.xlu0 %v1640_v50  ;;  %v1240_v50 = vor.u32 %v1484_v48, %v1239_v47  ;;  %v1236_v0 = vor.u32 %v1482_v62, %v1235_v61  ;;  %v1215_v1 = vld [vmem:[#allocation4 + $0xbc] sm:$0xf]  ;;  %v1478_v2 = vld [vmem:[#allocation4 + $0xe4] sm:$0xf0]  ;;  %v1217_v5 = vld [vmem:[#allocation4 + $0xe8] sm:$0xf0] }
  0x2d   :  { %257 = vmatpush.bf16.msra.mxu1 %v1112_v7  ;;  %346 = vperm.xlu1 %1547, %v65_v14   ;;  %v1216_v4 = vor.u32 %v1478_v2, %v1215_v1  ;;  %v1223_v6 = vld [vmem:[#allocation4 + $0xc4] sm:$0xf]  ;;  %v1479_v7 = vld [vmem:[#allocation4 + $0xec] sm:$0xf0]  ;;  %v1220_v8 = vor.u32 %v1477_v3, %v1217_v5  ;;  %v1474_v12 = vld [vmem:[#allocation4 + $0x68] sm:$0xf] }
  0x2e   :  { %239 = vmatpush.bf16.msra.mxu0 %v1096_v9  ;;  %342 = vperm.xlu0 %1549, %v64_v60   ;;  %v1229_v60 = vld [vmem:[#allocation4 + $0x140] sm:$0xf0]  ;;  %v1224_v9 = vor.u32 %v1479_v7, %v1223_v6  ;;  %v1475_v11 = vld [vmem:[#allocation4 + $0x8c] sm:$0xf0]  ;;  %v1476_v17 = vld [vmem:[#allocation4 + $0x94] sm:$0xf0] }
  0x2f   :  { %277 = vmatpush.bf16.msra.mxu2 %v1104_v13  ;;  %534 = vmatpush.bf16.msra.mxu3 %v1252_v41  ;;  %v1232_v63 = vor.u32 %v1480_v58, %v1229_v60  ;;  %v1203_v10 = vld [vmem:[#allocation4 + $0x64] sm:$0xf]  ;;  %v1191_v20 = vld [vmem:[#allocation4 + $0xc] sm:$0xf]  ;;  %v1472_v21 = vld [vmem:[#allocation4 + $0x34] sm:$0xf0] }
  0x30   :  { %v1204_v14 = vor.u32 %v1475_v11, %v1203_v10  ;;  %v1471_v22 = vld [vmem:[#allocation4 + $0x10] sm:$0xf]  ;;  %v1192_v23 = vor.u32 %v1472_v21, %v1191_v20  ;;  %v1193_v24 = vld [vmem:[#allocation4 + $0x38] sm:$0xf0]  ;;  %v1199_v25 = vld [vmem:[#allocation4 + $0x14] sm:$0xf] }
  0x31   :  { %240 = vmatmul.bf16.vlgmr.msra.gmra.mxu0 %v102_v15  ;;  %258 = vmatpush.bf16.msra.mxu1 %v1100_v16  ;;  %v1211_v16 = vld [vmem:[#allocation4 + $0x6c] sm:$0xf]  ;;  %v1473_v26 = vld [vmem:[#allocation4 + $0x3c] sm:$0xf0]  ;;  %v1672_v34 = vshrl.u32 %v293_v32, 7 }
  0x32   :  { %278 = vmatmul.bf16.vlgmr.msra.gmra.mxu2 %v102_v15  ;;  %551 = vmatpush.bf16.msrb.mxu0 %v1280_v27  ;;  %v1196_v27 = vor.u32 %v1471_v22, %v1193_v24  ;;  %v353_v61 = vld [vmem:[#allocation6] ss:$0 sm:$0xff] }
  0x33   :  { %535 = vmatpush.bf16.msra.mxu3 %v1240_v50  ;;  %vm295_vm0 = vcmp.lt.s32.totalorder %v1672_v34, 1  ;;  %vm328_vm1 = vcmp.lt.s32.totalorder %v1672_v34, 7 }
  0x34   :  { %259 = vmatmul.bf16.vlgmr.msra.gmra.mxu1 %v102_v15  ;;  %v1205_v15 = vld [vmem:[#allocation4 + $0x90] sm:$0xf0] }
  0x35   :  { %570 = vmatpush.bf16.msrb.mxu1 %v1284_v28  ;;  %v1208_v18 = vor.u32 %v1474_v12, %v1205_v15  ;;  %v1200_v28 = vor.u32 %v1473_v26, %v1199_v25 }
  0x36   :  { %552 = vmatpush.bf16.msrb.mxu0 %v1268_v35 }
  0x37   :  { %536 = vmatpush.bf16.msra.mxu3 %v1228_v59 }
  0x39   :  { %571 = vmatpush.bf16.msrb.mxu1 %v1272_v37 }
  0x3a   :  { %553 = vmatpush.bf16.msrb.mxu0 %v1256_v44 }
  0x3b   :  { %537 = vmatpush.bf16.msra.mxu3 %v1216_v4 }
  0x3d   :  { %572 = vmatpush.bf16.msrb.mxu1 %v1260_v46 }
  0x3e   :  { %554 = vmatpush.bf16.msrb.mxu0 %v1244_v54 }
  0x3f   :  { %538 = vmatpush.bf16.msra.mxu3 %v1204_v14 }
  0x41   :  { %245 = vmatmul.bf16.gmra.mxu0 %v103_v19  ;;  %573 = vmatpush.bf16.msrb.mxu1 %v1248_v55 }
  0x42   :  { %283 = vmatmul.bf16.gmra.mxu2 %v103_v19  ;;  %555 = vmatpush.bf16.msrb.mxu0 %v1232_v63 }
  0x43   :  { %539 = vmatpush.bf16.msra.mxu3 %v1192_v23 }
  0x44   :  { %264 = vmatmul.bf16.gmra.mxu1 %v103_v19  ;;  %v1212_v19 = vor.u32 %v1476_v17, %v1211_v16 }
  0x45   :  { %574 = vmatpush.bf16.msrb.mxu1 %v1236_v0 }
  0x46   :  { %556 = vmatpush.bf16.msrb.mxu0 %v1220_v8 }
  0x49   :  { %575 = vmatpush.bf16.msrb.mxu1 %v1224_v9 }
  0x4a   :  { %557 = vmatpush.bf16.msrb.mxu0 %v1208_v18 }
  0x4d   :  { %576 = vmatpush.bf16.msrb.mxu1 %v1212_v19 }
  0x4e   :  { %558 = vmatpush.bf16.msrb.mxu0 %v1196_v27 }
  0x51   :  { %577 = vmatpush.bf16.msrb.mxu1 %v1200_v28 }
  0x79   :  { %v1682_v45 = vpop.permute.xlu2 %312 }
  0x81   :  { %v1700_v5 = vpop.permute.xlu2 %317 }
  0x8e   :  { %v1670_v33 = vpop.permute.xlu0 %302 }
  0x8f   :  { %v1674_v36 = vpop.permute.xlu1 %334 }
  0x96   :  { %v1677_v41 = vpop.permute.xlu0 %307 }
  0x97   :  { %v1685_v51 = vpop.permute.xlu1 %338 }
  0x9f   :  { %v1716_v15 = vpop.permute.xlu1 %346 }
  0xa0   :  { %v1710_v10 = vpop.permute.xlu0 %342 }
  0xae   :  { %v241_v13 = vpop.f32.mrf.mxu0 }
  0xaf   :  { %v289_v40 = vrot.slane %v241_v13, 7 }
  0xb1   :  { %v260_v29 = vpop.f32.mrf.mxu1 }
  0xb5   :  { %v279_v30 = vpop.f32.mrf.mxu2 }
  0xb6   :  { %v243_v31 = vpop.f32.mrf.mxu0  ;;  %v324_v49 = vrot.slane %v279_v30, 1  ;;  %v1517_v30 = vld [vmem:[#allocation4 + $0x2a8] sm:$0xf0] }
  0xb7   :  { %v290_v37 = vrot.slane %v243_v31, 7  ;;  %v1516_v31 = vld [vmem:[#allocation4 + $0x284] sm:$0xf] }
  0xb9   :  { %v262_v39 = vpop.f32.mrf.mxu1  ;;  %v298_v42 = vsel %vm295_vm0, %v289_v40, %v290_v37 }
  0xba   :  { %v321_v43 = vmul.f32 %v1677_v41, %v298_v42  ;;  %v1359_v42 = vld [vmem:[#allocation4 + $0x228] sm:$0xf] }
  0xbc   :  { %v355_v53 = vadd.f32 %v321_v43, %v262_v39  ;;  %v1514_v43 = vld [vmem:[#allocation4 + $0x250] sm:$0xf0] }
  0xbd   :  { %v281_v35 = vpop.f32.mrf.mxu2 }
  0xbe   :  { %v246_v38 = vpop.f32.mrf.mxu0  ;;  %v325_v44 = vrot.slane %v281_v35, 1  ;;  %v1373_v35 = vld [vmem:[#allocation4 + $0x2ac] sm:$0xf0] }
  0xbf   :  { %v291_v59 = vrot.slane %v246_v38, 7  ;;  %v1518_v38 = vld [vmem:[#allocation4 + $0x2b0] sm:$0xf0]  ;;  %v1376_v39 = vor.u32 %v1516_v31, %v1373_v35  ;;  %v1319_v35 = vld [vmem:[#allocation4 + $0xd0] sm:$0xf] }
  0xc0   :  { %v331_v54 = vsel %vm328_vm1, %v324_v49, %v325_v44 }
  0xc1   :  { %v265_v55 = vpop.f32.mrf.mxu1  ;;  %v349_v62 = vmul.f32 %v1674_v36, %v331_v54  ;;  %v297_v4 = vsel %vm295_vm0, %v290_v37, %v291_v59  ;;  %v1379_v37 = vld [vmem:[#allocation4 + $0x288] sm:$0xf]  ;;  %811 = vmatpush.bf16.msrb.mxu3 %v1376_v39  ;;  %v1511_v54 = vld [vmem:[#allocation4 + $0x1f8] sm:$0xf0] }
  0xc2   :  { %v322_v11 = vmul.f32 %v1682_v45, %v297_v4  ;;  %v1343_v4 = vld [vmem:[#allocation4 + $0x180] sm:$0xf] }
  0xc4   :  { %v356_v20 = vadd.f32 %v322_v11, %v265_v55  ;;  %v1510_v55 = vld [vmem:[#allocation4 + $0x1d4] sm:$0xf]  ;;  %v1323_v11 = vld [vmem:[#allocation4 + $0x120] sm:$0xf] }
  0xc5   :  { %v284_v46 = vpop.f32.mrf.mxu2 }
  0xc6   :  { %v326_v47 = vrot.slane %v284_v46, 1  ;;  %v248_v48 = vpop.f32.mrf.mxu0  ;;  %v1360_v46 = vor.u32 %v1514_v43, %v1359_v42  ;;  %v1499_v42 = vld [vmem:[#allocation4 + $0x98] sm:$0xf0]  ;;  %v1498_v43 = vld [vmem:[#allocation4 + $0x74] sm:$0xf] }
  0xc7   :  { %v292_v50 = vrot.slane %v248_v48, 7  ;;  %v1367_v48 = vld [vmem:[#allocation4 + $0x230] sm:$0xf] }
  0xc8   :  { %v330_v52 = vsel %vm328_vm1, %v325_v44, %v326_v47  ;;  %v1513_v44 = vld [vmem:[#allocation4 + $0x22c] sm:$0xf] }
  0xc9   :  { %v350_v56 = vmul.f32 %v1685_v51, %v330_v52  ;;  %v299_v57 = vsel %vm295_vm0, %v292_v50, %v289_v40  ;;  %v296_v6 = vsel %vm295_vm0, %v291_v59, %v292_v50  ;;  %v267_v16 = vpop.f32.mrf.mxu1  ;;  %v1380_v40 = vor.u32 %v1518_v38, %v1379_v37  ;;  %v1512_v59 = vld [vmem:[#allocation4 + $0x200] sm:$0xf0]  ;;  %v1503_v38 = vld [vmem:[#allocation4 + $0xf8] sm:$0xf0] }
  0xca   :  { %v320_v58 = vmul.f32 %v1670_v33, %v299_v57  ;;  %v323_v12 = vmul.f32 %v1700_v5, %v296_v6  ;;  %v1349_v57 = vld [vmem:[#allocation4 + $0x1fc] sm:$0xf0]  ;;  %v1509_v6 = vld [vmem:[#allocation4 + $0x1a8] sm:$0xf0]  ;;  %v1320_v39 = vor.u32 %v1503_v38, %v1319_v35 }
  0xcb   :  { %v359_v60 = vadd.f32 %v355_v53, %v350_v56  ;;  %830 = vmatpush.bf16.msra.mxu0 %v1380_v40  ;;  %v1347_v53 = vld [vmem:[#allocation4 + $0x1d0] sm:$0xf] }
  0xcc   :  { %v354_v63 = vadd.f32 %v320_v58, %v260_v29  ;;  %v357_v21 = vadd.f32 %v323_v12, %v267_v16  ;;  %v1371_v29 = vld [vmem:[#allocation4 + $0x280] sm:$0xf]  ;;  %v1348_v56 = vor.u32 %v1511_v54, %v1347_v53  ;;  %v1355_v58 = vld [vmem:[#allocation4 + $0x1d8] sm:$0xf]  ;;  %v1505_v12 = vld [vmem:[#allocation4 + $0x148] sm:$0xf0] }
  0xcd   :  { %v286_v0 = vpop.f32.mrf.mxu2  ;;  %v1696_v3 = vadd.f32 %v359_v60, %v353_v61  ;;  %v1372_v32 = vor.u32 %v1517_v30, %v1371_v29  ;;  %v1352_v60 = vor.u32 %v1510_v55, %v1349_v57  ;;  %v1504_v16 = vld [vmem:[#allocation4 + $0x124] sm:$0xf]  ;;  %v1502_v29 = vld [vmem:[#allocation4 + $0xf0] sm:$0xf0]  ;;  %v1501_v30 = vld [vmem:[#allocation4 + $0xcc] sm:$0xf] }
  0xce   :  { %v327_v1 = vrot.slane %v286_v0, 1  ;;  %v358_v2 = vadd.f32 %v354_v63, %v349_v62  ;;  %v1335_v62 = vld [vmem:[#allocation4 + $0x178] sm:$0xf]  ;;  %v1508_v63 = vld [vmem:[#allocation4 + $0x1a0] sm:$0xf0] }
  0xcf   :  { %v367_v14 = vmax.f32 %v1696_v3, 0.0  ;;  %792 = vmatpush.bf16.msrb.mxu2 %v1372_v32  ;;  %v1507_v0 = vld [vmem:[#allocation4 + $0x17c] sm:$0xf]  ;;  %v1313_v32 = vld [vmem:[#allocation4 + $0xf4] sm:$0xf0] }
  0xd0   :  { %v1704_v7 = vadd.f32 %v358_v2, %v353_v61  ;;  %v332_v8 = vsel %vm328_vm1, %v327_v1, %v324_v49  ;;  %v329_v9 = vsel %vm328_vm1, %v326_v47, %v327_v1  ;;  %v1361_v47 = vld [vmem:[#allocation4 + $0x254] sm:$0xf0]  ;;  %v1515_v49 = vld [vmem:[#allocation4 + $0x258] sm:$0xf0]  ;;  %v1336_v1 = vor.u32 %v1508_v63, %v1335_v62  ;;  %v1337_v2 = vld [vmem:[#allocation4 + $0x1a4] sm:$0xf0] }
  0xd1   :  { %v352_v17 = vmul.f32 %v1716_v15, %v332_v8  ;;  %v351_v18 = vmul.f32 %v1710_v10, %v329_v9  ;;  %v1364_v50 = vor.u32 %v1513_v44, %v1361_v47  ;;  %v1368_v52 = vor.u32 %v1515_v49, %v1367_v48  ;;  %v1299_v40 = vld [vmem:[#allocation4 + $0x70] sm:$0xf]  ;;  %v1307_v47 = vld [vmem:[#allocation4 + $0x78] sm:$0xf]  ;;  %v1500_v48 = vld [vmem:[#allocation4 + $0xa0] sm:$0xf0] }
  0xd2   :  { %v366_v13 = vmax.f32 %v1704_v7, 0.0  ;;  %v1340_v8 = vor.u32 %v1507_v0, %v1337_v2  ;;  %v1344_v9 = vor.u32 %v1509_v6, %v1343_v4  ;;  %v1316_v37 = vor.u32 %v1501_v30, %v1313_v32  ;;  %v1287_v53 = vld [vmem:[#allocation4 + $0x18] sm:$0xf]  ;;  %v1496_v54 = vld [vmem:[#allocation4 + $0x40] sm:$0xf0] }
  0xd3   :  { %v361_v22 = vadd.f32 %v357_v21, %v352_v17  ;;  %v360_v23 = vadd.f32 %v356_v20, %v351_v18  ;;  %793 = vmatpush.bf16.msrb.mxu2 %v1360_v46  ;;  %812 = vmatpush.bf16.msrb.mxu3 %v1364_v50  ;;  %v1324_v17 = vor.u32 %v1505_v12, %v1323_v11  ;;  %v1325_v18 = vld [vmem:[#allocation4 + $0x14c] sm:$0xf0]  ;;  %v1506_v20 = vld [vmem:[#allocation4 + $0x150] sm:$0xf0]  ;;  %v1301_v46 = vld [vmem:[#allocation4 + $0x9c] sm:$0xf0] }
  0xd4   :  { %v402_v19 = vpack.c.bf16 %v367_v14, %v366_v13  ;;  %831 = vmatpush.bf16.msra.mxu0 %v1368_v52  ;;  %v1328_v21 = vor.u32 %v1504_v16, %v1325_v18  ;;  %v1300_v44 = vor.u32 %v1499_v42, %v1299_v40  ;;  %v1304_v50 = vor.u32 %v1498_v43, %v1301_v46  ;;  %v1495_v55 = vld [vmem:[#allocation4 + $0x1c] sm:$0xf]  ;;  %v1295_v57 = vld [vmem:[#allocation4 + $0x20] sm:$0xf]  ;;  %v1384_v3 = vld [vmem:[#allocation4 + $0x24] sm:$0xf] }
  0xd5   :  { %v1724_v24 = vadd.f32 %v360_v23, %v353_v61  ;;  %v1726_v25 = vadd.f32 %v361_v22, %v353_v61  ;;  %v1356_v61 = vor.u32 %v1512_v59, %v1355_v58  ;;  %v1308_v52 = vor.u32 %v1500_v48, %v1307_v47  ;;  %v1497_v59 = vld [vmem:[#allocation4 + $0x48] sm:$0xf0] }
  0xd6   :  { %540 = vmatmul.bf16.vlgmr.msra.gmra.mxu3 %v402_v19  ;;  %559 = vmatmul.bf16.vlgmr.msrb.gmra.mxu0 %v402_v19  ;;  %v1288_v58 = vor.u32 %v1496_v54, %v1287_v53  ;;  %v1296_v62 = vor.u32 %v1497_v59, %v1295_v57 }
  0xd7   :  { %578 = vmatmul.bf16.vlgmr.msrb.gmra.mxu1 %v402_v19  ;;  %v368_v26 = vmax.f32 %v1724_v24, 0.0  ;;  %v369_v27 = vmax.f32 %v1726_v25, 0.0  ;;  %794 = vmatpush.bf16.msrb.mxu2 %v1348_v56  ;;  %v1331_v19 = vld [vmem:[#allocation4 + $0x128] sm:$0xf] }
  0xd8   :  { %813 = vmatpush.bf16.msrb.mxu3 %v1352_v60  ;;  %832 = vmatpush.bf16.msra.mxu0 %v1356_v61  ;;  %v1332_v22 = vor.u32 %v1506_v20, %v1331_v19  ;;  %v1289_v56 = vld [vmem:[#allocation4 + $0x44] sm:$0xf0] }
  0xd9   :  { %v403_v28 = vpack.c.bf16 %v369_v27, %v368_v26  ;;  %v1292_v60 = vor.u32 %v1495_v55, %v1289_v56 }
  0xdb   :  { %795 = vmatpush.bf16.msrb.mxu2 %v1336_v1 }
  0xdc   :  { %814 = vmatpush.bf16.msrb.mxu3 %v1340_v8  ;;  %833 = vmatpush.bf16.msra.mxu0 %v1344_v9 }
  0xdf   :  { %796 = vmatpush.bf16.msrb.mxu2 %v1324_v17 }
  0xe0   :  { %815 = vmatpush.bf16.msrb.mxu3 %v1328_v21  ;;  %834 = vmatpush.bf16.msra.mxu0 %v1332_v22 }
  0xe4   :  { %816 = vmatpush.bf16.msrb.mxu3 %v1316_v37  ;;  %835 = vmatpush.bf16.msra.mxu0 %v1320_v39  ;;  %v613_v37 = vld [vmem:[#allocation6 + $0x1] ss:$0 sm:$0xff] }
  0xe6   :  { %545 = vmatmul.bf16.gmra.mxu3 %v403_v28  ;;  %564 = vmatmul.bf16.gmra.mxu0 %v403_v28 }
  0xe7   :  { %583 = vmatmul.bf16.gmra.mxu1 %v403_v28  ;;  %v1311_v28 = vld [vmem:[#allocation4 + $0xc8] sm:$0xf] }
  0xe8   :  { %v1312_v31 = vor.u32 %v1502_v29, %v1311_v28  ;;  %817 = vmatpush.bf16.msrb.mxu3 %v1304_v50  ;;  %836 = vmatpush.bf16.msra.mxu0 %v1308_v52 }
  0xea   :  { %797 = vmatpush.bf16.msrb.mxu2 %v1312_v31 }
  0xec   :  { %818 = vmatpush.bf16.msrb.mxu3 %v1292_v60  ;;  %837 = vmatpush.bf16.msra.mxu0 %v1296_v62 }
  0xee   :  { %798 = vmatpush.bf16.msrb.mxu2 %v1300_v44 }
  0xf2   :  { %799 = vmatpush.bf16.msrb.mxu2 %v1288_v58 }
 0x153   :  { %v560_v63 = vpop.f32.mrf.mxu0 }
 0x154   :  { %v1734_v23 = vpop.f32.mrf.mxu1 }
 0x155   :  { %v601_v21 = vrot.slane %v1734_v23, 1 }
 0x159   :  { %v541_v49 = vpop.f32.mrf.mxu3 }
 0x15a   :  { %v589_v4 = vrot.slane %v541_v49, 7 }
 0x15b   :  { %v562_v8 = vpop.f32.mrf.mxu0 }
 0x15c   :  { %v581_v61 = vpop.f32.mrf.mxu1 }
 0x15d   :  { %v602_v12 = vrot.slane %v581_v61, 1 }
 0x15f   :  { %v607_v28 = vsel %vm328_vm1, %v601_v21, %v602_v12 }
 0x160   :  { %v609_v38 = vmul.f32 %v607_v28, %v1674_v36  ;;  %v1440_v28 = vld [vmem:[#allocation4 + $0x28c] sm:$0xf] }
 0x161   :  { %v543_v0 = vpop.f32.mrf.mxu3 }
 0x162   :  { %v590_v1 = vrot.slane %v543_v0, 7 }
 0x163   :  { %v565_v29 = vpop.f32.mrf.mxu0 }
 0x164   :  { %v584_v2 = vpop.f32.mrf.mxu1  ;;  %v595_v9 = vsel %vm295_vm0, %v589_v4, %v590_v1 }
 0x165   :  { %v603_v11 = vrot.slane %v584_v2, 1  ;;  %v598_v16 = vmul.f32 %v595_v9, %v1677_v41 }
 0x167   :  { %v606_v17 = vsel %vm328_vm1, %v602_v12, %v603_v11  ;;  %v615_v18 = vadd.f32 %v598_v16, %v562_v8 }
 0x168   :  { %v610_v19 = vmul.f32 %v606_v17, %v1685_v51 }
 0x169   :  { %v546_v6 = vpop.f32.mrf.mxu3 }
 0x16a   :  { %v619_v31 = vadd.f32 %v615_v18, %v610_v19  ;;  %v591_v35 = vrot.slane %v546_v6, 7 }
 0x16b   :  { %v567_v53 = vpop.f32.mrf.mxu0 }
 0x16c   :  { %v586_v39 = vpop.f32.mrf.mxu1  ;;  %v623_v43 = vadd.f32 %v619_v31, %v613_v37  ;;  %v594_v44 = vsel %vm295_vm0, %v590_v1, %v591_v35 }
 0x16d   :  { %v604_v46 = vrot.slane %v586_v39, 1  ;;  %v599_v49 = vmul.f32 %v594_v44, %v1682_v45  ;;  %v1434_v44 = vld [vmem:[#allocation4 + $0x260] sm:$0xf0] }
 0x16e   :  { %v627_v52 = vmax.f32 %v623_v43, 0.0  ;;  %v1531_v43 = vld [vmem:[#allocation4 + $0x238] sm:$0xf] }
 0x16f   :  { %v605_v54 = vsel %vm328_vm1, %v603_v11, %v604_v46  ;;  %v608_v55 = vsel %vm328_vm1, %v604_v46, %v601_v21  ;;  %v616_v58 = vadd.f32 %v599_v49, %v565_v29  ;;  %v1534_v29 = vld [vmem:[#allocation4 + $0x2b4] sm:$0xf0] }
 0x170   :  { %v611_v59 = vmul.f32 %v605_v54, %v1710_v10  ;;  %v612_v60 = vmul.f32 %v608_v55, %v1716_v15  ;;  %v1441_v31 = vor.u32 %v1534_v29, %v1440_v28  ;;  %v1530_v54 = vld [vmem:[#allocation4 + $0x204] sm:$0xf0] }
 0x171   :  { %v548_v20 = vpop.f32.mrf.mxu3 }
 0x172   :  { %v592_v22 = vrot.slane %v548_v20, 7  ;;  %v620_v62 = vadd.f32 %v616_v58, %v611_v59  ;;  %1021 = vmatpush.bf16.msra.mxu2 %v1441_v31  ;;  %v1529_v58 = vld [vmem:[#allocation4 + $0x1e0] sm:$0xf]  ;;  %v1426_v59 = vld [vmem:[#allocation4 + $0x208] sm:$0xf0] }
 0x174   :  { %v596_v30 = vsel %vm295_vm0, %v592_v22, %v589_v4  ;;  %v593_v23 = vsel %vm295_vm0, %v591_v35, %v592_v22  ;;  %v624_v0 = vadd.f32 %v620_v62, %v613_v37  ;;  %v1442_v35 = vld [vmem:[#allocation4 + $0x2b8] sm:$0xf0] }
 0x175   :  { %v597_v32 = vmul.f32 %v596_v30, %v1670_v33  ;;  %v600_v47 = vmul.f32 %v593_v23, %v1700_v5 }
 0x176   :  { %v628_v2 = vmax.f32 %v624_v0, 0.0 }
 0x177   :  { %v614_v40 = vadd.f32 %v597_v32, %v560_v63  ;;  %v617_v56 = vadd.f32 %v600_v47, %v567_v53  ;;  %v1533_v32 = vld [vmem:[#allocation4 + $0x290] sm:$0xf]  ;;  %v1424_v53 = vld [vmem:[#allocation4 + $0x1dc] sm:$0xf] }
 0x178   :  { %v1445_v23 = vor.u32 %v1533_v32, %v1442_v35  ;;  %v1425_v62 = vor.u32 %v1530_v54, %v1424_v53  ;;  %v1408_v32 = vld [vmem:[#allocation4 + $0x12c] sm:$0xf]  ;;  %v1526_v35 = vld [vmem:[#allocation4 + $0x154] sm:$0xf0]  ;;  %v1392_v54 = vld [vmem:[#allocation4 + $0x7c] sm:$0xf] }
 0x179   :  { %v618_v42 = vadd.f32 %v614_v40, %v609_v38  ;;  %v621_v61 = vadd.f32 %v617_v56, %v612_v60 }
 0x17a   :  { %1034 = vmatpush.bf16.msra.mxu3 %v1445_v23  ;;  %v1400_v23 = vld [vmem:[#allocation4 + $0xd4] sm:$0xf] }
 0x17b   :  { %v622_v48 = vadd.f32 %v618_v42, %v613_v37  ;;  %v625_v63 = vadd.f32 %v621_v61, %v613_v37  ;;  %v1432_v37 = vld [vmem:[#allocation4 + $0x234] sm:$0xf]  ;;  %v1532_v42 = vld [vmem:[#allocation4 + $0x25c] sm:$0xf0] }
 0x17c   :  { %v1433_v49 = vor.u32 %v1532_v42, %v1432_v37  ;;  %v1524_v42 = vld [vmem:[#allocation4 + $0xfc] sm:$0xf0] }
 0x17d   :  { %v626_v50 = vmax.f32 %v622_v48, 0.0  ;;  %v629_v1 = vmax.f32 %v625_v63, 0.0 }
 0x17e   :  { %1022 = vmatpush.bf16.msra.mxu2 %v1433_v49 }
 0x17f   :  { %v662_v57 = vpack.c.bf16 %v627_v52, %v626_v50  ;;  %v663_v4 = vpack.c.bf16 %v629_v1, %v628_v2  ;;  %v1437_v52 = vor.u32 %v1531_v43, %v1434_v44  ;;  %v1429_v1 = vor.u32 %v1529_v58, %v1426_v59  ;;  %v1416_v2 = vld [vmem:[#allocation4 + $0x184] sm:$0xf]  ;;  %v1394_v58 = vld [vmem:[#allocation4 + $0xa8] sm:$0xf0] }
 0x181   :  { %800 = vmatmul.bf16.vlgmr.msrb.gmra.mxu2 %v662_v57  ;;  %819 = vmatmul.bf16.vlgmr.msrb.gmra.mxu3 %v662_v57 }
 0x182   :  { %838 = vmatmul.bf16.vlgmr.msra.gmra.mxu0 %v662_v57  ;;  %1035 = vmatpush.bf16.msra.mxu3 %v1437_v52  ;;  %v894_v52 = vld [vmem:[#allocation6] sm:$0xc0] }
 0x183   :  { %1023 = vmatpush.bf16.msra.mxu2 %v1425_v62  ;;  %v895_v7 = vpack.c.bf16 %v894_v52, %v894_v52  ;;  %v1519_v62 = vld [vmem:[#allocation4 + $0x28] sm:$0xf] }
 0x186   :  { %1036 = vmatpush.bf16.msra.mxu3 %v1429_v1 }
 0x191   :  { %805 = vmatmul.bf16.gmra.mxu2 %v663_v4  ;;  %824 = vmatmul.bf16.gmra.mxu3 %v663_v4 }
 0x192   :  { %843 = vmatmul.bf16.gmra.mxu0 %v663_v4  ;;  %v1528_v4 = vld [vmem:[#allocation4 + $0x1ac] sm:$0xf0] }
 0x1ff   :  { %v839_v6 = vpop.f32.mrf.mxu0 }
 0x200   :  { %v861_v60 = vrot.slane %v839_v6, 1 }
 0x204   :  { %v801_v8 = vpop.f32.mrf.mxu2  ;;  %v1761_v9 = vpop.f32.mrf.mxu3 }
 0x205   :  { %v849_v19 = vrot.slane %v801_v8, 7 }
 0x207   :  { %v841_v11 = vpop.f32.mrf.mxu0 }
 0x208   :  { %v862_v46 = vrot.slane %v841_v11, 1 }
 0x20a   :  { %v867_v8 = vsel %vm328_vm1, %v861_v60, %v862_v46 }
 0x20c   :  { %v803_v12 = vpop.f32.mrf.mxu2  ;;  %v822_v16 = vpop.f32.mrf.mxu3 }
 0x20d   :  { %v850_v18 = vrot.slane %v803_v12, 7  ;;  %v1527_v12 = vld [vmem:[#allocation4 + $0x188] sm:$0xf] }
 0x20f   :  { %v844_v17 = vpop.f32.mrf.mxu0  ;;  %v855_v30 = vsel %vm295_vm0, %v849_v19, %v850_v18 }
 0x210   :  { %v863_v21 = vrot.slane %v844_v17, 1  ;;  %v858_v50 = vmul.f32 %v855_v30, %v1677_v41  ;;  %v1418_v17 = vld [vmem:[#allocation4 + $0x1b0] sm:$0xf0]  ;;  %v873_v30 = vld [vmem:[#allocation6 + $0x2] ss:$0 sm:$0xff] }
 0x211   :  { %v1421_v31 = vor.u32 %v1527_v12, %v1418_v17  ;;  %v1050_v17 = vld [vmem:[#allocation6 + $0x4] ss:$8 sm:$0x3] }
 0x212   :  { %v866_v55 = vsel %vm328_vm1, %v862_v46, %v863_v21  ;;  %v875_v41 = vadd.f32 %v858_v50, %v822_v16  ;;  %v1401_v50 = vor.u32 %v1524_v42, %v1400_v23 }
 0x213   :  { %v870_v63 = vmul.f32 %v866_v55, %v1685_v51  ;;  %1037 = vmatpush.bf16.msra.mxu3 %v1421_v31  ;;  %v1522_v55 = vld [vmem:[#allocation4 + $0xa4] sm:$0xf0] }
 0x214   :  { %v806_v20 = vpop.f32.mrf.mxu2  ;;  %v825_v38 = vpop.f32.mrf.mxu3 }
 0x215   :  { %v851_v22 = vrot.slane %v806_v20, 7  ;;  %v1417_v20 = vor.u32 %v1528_v4, %v1416_v2  ;;  %v879_v28 = vadd.f32 %v875_v41, %v870_v63  ;;  %v1386_v63 = vld [vmem:[#allocation4 + $0x50] sm:$0xf0] }
 0x217   :  { %v854_v39 = vsel %vm295_vm0, %v850_v18, %v851_v22  ;;  %v846_v40 = vpop.f32.mrf.mxu0  ;;  %1024 = vmatpush.bf16.msra.mxu2 %v1417_v20  ;;  %v1053_v20 = vperm.slane %v1050_v17, 1 }
 0x218   :  { %v859_v47 = vmul.f32 %v854_v39, %v1682_v45  ;;  %v864_v48 = vrot.slane %v846_v40, 1  ;;  %v1409_v40 = vor.u32 %v1526_v35, %v1408_v32 }
 0x21a   :  { %v876_v56 = vadd.f32 %v859_v47, %v825_v38  ;;  %v865_v57 = vsel %vm328_vm1, %v863_v21, %v864_v48  ;;  %v869_v21 = vmul.f32 %v867_v8, %v1674_v36  ;;  %v1410_v38 = vld [vmem:[#allocation4 + $0x158] sm:$0xf0]  ;;  %v1523_v47 = vld [vmem:[#allocation4 + $0xd8] sm:$0xf] }
 0x21b   :  { %v871_v45 = vmul.f32 %v865_v57, %v1710_v10  ;;  %v868_v10 = vsel %vm328_vm1, %v864_v48, %v861_v60  ;;  %1025 = vmatpush.bf16.msra.mxu2 %v1409_v40  ;;  %v1521_v57 = vld [vmem:[#allocation4 + $0x80] sm:$0xf] }
 0x21c   :  { %v808_v61 = vpop.f32.mrf.mxu2  ;;  %v827_v29 = vpop.f32.mrf.mxu3  ;;  %v872_v34 = vmul.f32 %v868_v10, %v1716_v15  ;;  %v1402_v15 = vld [vmem:[#allocation4 + $0x100] sm:$0xf0]  ;;  %v935_v8 = vld [vmem:[#allocation6 + $0x3] ss:$8 sm:$0x3] }
 0x21d   :  { %v852_v0 = vrot.slane %v808_v61, 7  ;;  %v880_v11 = vadd.f32 %v876_v56, %v871_v45  ;;  %v1405_v53 = vor.u32 %v1523_v47, %v1402_v15  ;;  %v899_v61 = vrot.slane %v895_v7, 3 }
 0x21e   :  { %v938_v12 = vperm.slane %v935_v8, 1 }
 0x21f   :  { %v856_v6 = vsel %vm295_vm0, %v852_v0, %v849_v19  ;;  %v853_v51 = vsel %vm295_vm0, %v851_v22, %v852_v0  ;;  %v884_v37 = vadd.f32 %v880_v11, %v873_v30  ;;  %1026 = vmatpush.bf16.msra.mxu2 %v1401_v50  ;;  %v1389_v0 = vor.u32 %v1519_v62, %v1386_v63 }
 0x220   :  { %v857_v16 = vmul.f32 %v856_v6, %v1670_v33  ;;  %v860_v18 = vmul.f32 %v853_v51, %v1700_v5  ;;  %v1525_v33 = vld [vmem:[#allocation4 + $0x130] sm:$0xf]  ;;  %v937_v11 = vperm.slane %v935_v8, 0 }
 0x221   :  { %v1413_v36 = vor.u32 %v1525_v33, %v1410_v38  ;;  %v888_v44 = vadd.f32 %v884_v37, %v368_v26 }
 0x222   :  { %v874_v19 = vadd.f32 %v857_v16, %v1761_v9  ;;  %v877_v22 = vadd.f32 %v860_v18, %v827_v29  ;;  %v883_v9 = vadd.f32 %v879_v28, %v873_v30  ;;  %v1052_v16 = vperm.slane %v1050_v17, 0 }
 0x223   :  { %1038 = vmatpush.bf16.msra.mxu3 %v1413_v36  ;;  %v892_v24 = vmax.f32 %v888_v44, 0.0 }
 0x224   :  { %v878_v5 = vadd.f32 %v874_v19, %v869_v21  ;;  %v881_v39 = vadd.f32 %v877_v22, %v872_v34  ;;  %v887_v26 = vadd.f32 %v883_v9, %v367_v14  ;;  %v1520_v14 = vld [vmem:[#allocation4 + $0x4c] sm:$0xf0]  ;;  %v1064_v22 = vld [vmem:[#allocation6 + $0x5] ss:$0 sm:$0xff] }
 0x225   :  { %v1385_v41 = vor.u32 %v1520_v14, %v1384_v3 }
 0x226   :  { %v885_v43 = vadd.f32 %v881_v39, %v873_v30  ;;  %v882_v46 = vadd.f32 %v878_v5, %v873_v30  ;;  %v891_v45 = vmax.f32 %v887_v26, 0.0 }
 0x227   :  { %1039 = vmatpush.bf16.msra.mxu3 %v1405_v53 }
 0x228   :  { %v889_v48 = vadd.f32 %v885_v43, %v369_v27  ;;  %v886_v49 = vadd.f32 %v882_v46, %v366_v13  ;;  %v1393_v27 = vor.u32 %v1522_v55, %v1392_v54  ;;  %v1397_v13 = vor.u32 %v1521_v57, %v1394_v58 }
 0x22a   :  { %v893_v56 = vmax.f32 %v889_v48, 0.0  ;;  %v890_v25 = vmax.f32 %v886_v49, 0.0  ;;  %1027 = vmatpush.bf16.msra.mxu2 %v1393_v27 }
 0x22b   :  { %1040 = vmatpush.bf16.msra.mxu3 %v1397_v13 }
 0x22c   :  { %v897_v59 = vpack.c.bf16 %v893_v56, %v892_v24  ;;  %v896_v60 = vpack.c.bf16 %v891_v45, %v890_v25 }
 0x22e   :  { %910 = vmatpush.bf16.msra.mxu1 %v897_v59  ;;  %1028 = vmatpush.bf16.msra.mxu2 %v1385_v41 }
 0x22f   :  { %1041 = vmatpush.bf16.msra.mxu3 %v1389_v0 }
 0x232   :  { %911 = vmatpush.bf16.msra.mxu1 %v896_v60 }
 0x235   :  { %1381 = vmatmul.msk.bf16.vlgmr.msra.gmra.mxu1 %vm900_vm2, %v899_v61 }
 0x2b2   :  { %v913_v1 = vpop.f32.mrf.mxu1 }
 0x2b3   :  { %v933_v2 = vpack.c.bf16 %v913_v1, %v913_v1 }
 0x2b5   :  { %1029 = vmatmul.bf16.vlgmr.msra.gmra.mxu2 %v933_v2  ;;  %1042 = vmatmul.bf16.vlgmr.msra.gmra.mxu3 %v933_v2 }
 0x2ba   :  { %v915_v4 = vpop.f32.mrf.mxu1 }
 0x338   :  { %v1030_v10 = vpop.f32.mrf.mxu2  ;;  %v1043_v6 = vpop.f32.mrf.mxu3 }
 0x339   :  { %v1031_v51 = vadd.f32 %v1030_v10, %v937_v11  ;;  %v1044_v18 = vadd.f32 %v1043_v6, %v938_v12 }
 0x33b   :  { %v1047_v21 = vmax.f32 %v1031_v51, 0.0  ;;  %v1048_v28 = vmax.f32 %v1044_v18, 0.0 }
 0x33d   :  { %v1056_v29 = vmul.f32 %v1052_v16, %v1047_v21  ;;  %v1057_v30 = vmul.f32 %v1053_v20, %v1048_v28 }
 0x33f   :  { %v1059_v31 = vsel %vm1058_vm3, %v1056_v29, 0.0  ;;  %v1060_v32 = vsel %vm1058_vm3, %v1057_v30, 0.0 }
 0x340   :  { %v1061_v35 = vadd.f32 %v1060_v32, %v1059_v31  ;;  %v1032_v19 = vpop.f32.mrf.mxu2  ;;  %v1045_v34 = vpop.f32.mrf.mxu3 }
 0x342   :  { %1062 = vadd.xlane.f32.xlu2 %v1061_v35 }
 0x3b5   :  { %v1063_v37 = vpop.xlane.xlu2 %1062 }
 0x3b6   :  { %v1065_v33 = vadd.f32 %v1064_v22, %v1063_v37 }
 0x3b8   :  { %v1446_v38 = vmul.f32 -1.442695, %v1065_v33 }
 0x3ba   :  { %1550 = vpow2.f32 %v1446_v38 }
 0x3c0   :  { %v1551_v5 = vpop.eup %1550 }
 0x3c1   :  { %v1069_v39 = vadd.f32 1.0, %v1551_v5 }
 0x3c3   :  { %1552 = vrcp.f32 %v1069_v39  ;;  %v1081_v42 = vand.u32 2147483648, %v1069_v39  ;;  %v1079_v44 = vand.u32 2147483647, %v1069_v39  ;;  %vm1075_vm5 = vweird.f32 %v1069_v39 }
 0x3c5   :  { %v1082_v9 = vor.u32 1.1754944e-38, %v1081_v42  ;;  %vm1080_vm8 = vcmp.eq.f32.partialorder %v1079_v44, 8.507059e+37 }
 0x3c9   :  { %v1553_v40 = vpop.eup %1552 }
 0x3ca   :  { %v1071_v36 = vmul.f32 %v1553_v40, %v1069_v39  ;;  %vm1076_vm4 = vweird.f32 %v1553_v40 }
 0x3cb   :  { %vm1077_vm7 = vmor %vm1075_vm5, %vm1076_vm4 }
 0x3cc   :  { %v1072_v23 = vsub.f32 1.0, %v1071_v36 }
 0x3ce   :  { %v1073_v43 = vmul.f32 %v1553_v40, %v1072_v23 }
 0x3d0   :  { %v1074_v46 = vadd.f32 %v1553_v40, %v1073_v43 }
 0x3d2   :  { %v1078_v47 = vsel %vm1077_vm7, %v1553_v40, %v1074_v46 }
 0x3d3   :  { %v1083_v15 = vsel %vm1080_vm8, %v1082_v9, %v1078_v47 }
 0x3d4   :  { %1086 = vst.msk [vmem:[%s1802_s3] sm:$0x3] %vm1085_vm6, %v1083_v15 }
 0x3d5   :  { %1091 = vsyncpa [#allocation3], 1 }
 0x3d6   :  { %1092 = vsyncpa [#allocation5], 1 }

</bundles_post_ra>
